<compile_context>
chip_gen: v5e
topology: v5e:2x2
jax: 0.10.0
libtpu: 0.0.40
codegen_flags: <defaults>
</compile_context>

<pallas_src>
import functools

import jax
import jax.numpy as jnp
from jax.experimental import pallas as pl
from jax.experimental.pallas import tpu as pltpu

LANES = 128
MAX_TILE_ROWS = 2048   # (2048, 128) f32 block = 1 MiB per float input per step
SUB_ROWS = 32          # inner-loop chunk height (int8 sublane tile = 32 rows)
FOLD_ROWS = 8          # folded accumulator height == one f32 vreg
UNROLL = 4             # inner-loop unroll factor


def _fold(x):
    """Sum a (SUB_ROWS, 128) chunk's sublane groups down to (FOLD_ROWS, 128).

    Static vreg-aligned slices + VPU adds only (no XLU).  Same add count as
    accumulating the full chunk, but the carried accumulator is 1 vreg.
    """
    out = x[0:FOLD_ROWS]
    for r in range(FOLD_ROWS, SUB_ROWS, FOLD_ROWS):
        out = out + x[r:r + FOLD_ROWS]
    return out


def _silog_partial_kernel(*refs, tile_rows, n_rows, blocks_per_split,
                          num_splits, has_mask, min_depth):
    if has_mask:
        est_ref, gt_ref, mask_ref, sum_ref, sumsq_ref, cnt_ref = refs
    else:
        est_ref, gt_ref, sum_ref, sumsq_ref, cnt_ref = refs
        mask_ref = None

    c = pl.program_id(0)   # "parallel" core-split axis
    j = pl.program_id(1)   # "arbitrary" reduction axis over row blocks

    @pl.when(j == 0)
    def _init():
        sum_ref[...] = jnp.zeros_like(sum_ref)
        sumsq_ref[...] = jnp.zeros_like(sumsq_ref)
        cnt_ref[...] = jnp.zeros_like(cnt_ref)

    n_chunks = tile_rows // SUB_ROWS
    row0 = (c * blocks_per_split + j) * tile_rows

    def accumulate(row_check):
        if row_check:
            # Hoisted out of the loop (JAX does not CSE broadcast_in_dim).
            row_iota = jax.lax.broadcasted_iota(jnp.int32, (SUB_ROWS, LANES), 0)

        def body(k, carry):
            acc_s, acc_ss, acc_c = carry
            r = pl.multiple_of(k * SUB_ROWS, SUB_ROWS)
            est = est_ref[pl.ds(r, SUB_ROWS), :].astype(jnp.float32)
            gt = gt_ref[pl.ds(r, SUB_ROWS), :].astype(jnp.float32)
            if mask_ref is not None:
                valid = mask_ref[pl.ds(r, SUB_ROWS), :] != 0
            else:
                valid = gt > min_depth
            if row_check:
                # Guards the un-fetched (stale VMEM) region of a ragged block.
                valid = valid & (row_iota + (row0 + r) < n_rows)
            # Single log per element; select() drops the NaN/inf produced on
            # padded / invalid lanes, so no extra guards on est/gt are needed.
            d = jnp.where(valid, jnp.log(est / gt), 0.0)
            return (acc_s + _fold(d),
                    acc_ss + _fold(d * d),
                    acc_c + _fold(valid.astype(jnp.float32)))

        zeros = jnp.zeros((FOLD_ROWS, LANES), jnp.float32)
        acc_s, acc_ss, acc_c = jax.lax.fori_loop(
            0, n_chunks, body, (zeros, zeros, zeros),
            unroll=min(UNROLL, n_chunks))
        sum_ref[...] += acc_s
        sumsq_ref[...] += acc_ss
        cnt_ref[...] += acc_c

    if n_rows % tile_rows == 0:
        # Every block is fully populated: hot path only, no row check at all.
        accumulate(row_check=False)
    else:
        # Only the globally-last block is ragged; everything else stays hot.
        is_last = jnp.logical_and(c == num_splits - 1,
                                  j == blocks_per_split - 1)

        @pl.when(jnp.logical_not(is_last))
        def _hot():
            accumulate(row_check=False)

        @pl.when(is_last)
        def _cold():
            accumulate(row_check=True)


def _as_lane_rows(x, n_rows, total):
    """Flatten to [n_rows, 128] in the array's NATIVE dtype (no cast pass)."""
    flat = jnp.asarray(x).reshape(-1)
    padded_total = n_rows * LANES
    if padded_total != total:
        # TODO(synk): lane-misaligned totals still pay one jnp.pad copy; a
        # manual-DMA pl.ANY path could remove even this.
        flat = jnp.pad(flat, (0, padded_total - total))
    return flat.reshape(n_rows, LANES)


@functools.partial(jax.jit, static_argnames=("variance_focus", "min_depth"))
def silog_loss(depth_est, depth_gt, mask=None, *, variance_focus=0.85,
               min_depth=1e-3):
    """Pallas TPU implementation of silog_loss.forward.

    mask=None enables the mask-free fast path: validity is derived in-kernel
    from `depth_gt > min_depth` (the usual depth-pipeline definition), saving
    the whole mask HBM stream.
    """
    total = depth_est.size
    n_rows = max(pl.cdiv(total, LANES), SUB_ROWS)

    inputs = [_as_lane_rows(depth_est, n_rows, total),
              _as_lane_rows(depth_gt, n_rows, total)]
    if mask is not None:
        mask = jnp.asarray(mask)
        if mask.dtype == jnp.bool_:
            # XLA can't bitcast PRED -> int8, so a 1-byte convert is the
            # cheapest materialization; non-bool masks stream through in
            # their native dtype and are compared against 0 in the kernel.
            mask = mask.astype(jnp.int8)
        inputs.append(_as_lane_rows(mask, n_rows, total))

    # Biggest block that is a multiple of SUB_ROWS (=32, satisfies both the
    # f32 (8,128) and int8 (32,128) tiling constraints) and not larger than
    # the array.  A ragged last block is handled by the in-kernel cold path.
    tile_rows = min(MAX_TILE_ROWS, (n_rows // SUB_ROWS) * SUB_ROWS)
    n_blocks = pl.cdiv(n_rows, tile_rows)

    # Split the row blocks across the leading "parallel" axis (2 TensorCores
    # on v7x) only when it divides evenly, so 1-TC chips / odd block counts
    # never run a wasted fully-masked overhang step or a duplicate DMA.
    # TODO(synk): chip-aware split (keep 2-way on v7x even for odd n_blocks).
    num_splits = 2 if (n_blocks >= 2 and n_blocks % 2 == 0) else 1
    blocks_per_split = n_blocks // num_splits
    grid = (num_splits, blocks_per_split)

    def in_map(c, j):
        return (c * blocks_per_split + j, 0)

    in_specs = [pl.BlockSpec((tile_rows, LANES), in_map) for _ in inputs]
    out_spec = pl.BlockSpec((None, FOLD_ROWS, LANES), lambda c, j: (c, 0, 0))
    part = jax.ShapeDtypeStruct((num_splits, FOLD_ROWS, LANES), jnp.float32)

    kernel = functools.partial(
        _silog_partial_kernel,
        tile_rows=tile_rows, n_rows=n_rows, blocks_per_split=blocks_per_split,
        num_splits=num_splits, has_mask=mask is not None,
        min_depth=float(min_depth))

    sums, sumsqs, cnts = pl.pallas_call(
        kernel,
        out_shape=(part, part, part),
        grid_spec=pltpu.PrefetchScalarGridSpec(
            num_scalar_prefetch=0,
            grid=grid,
            in_specs=in_specs,
            out_specs=[out_spec, out_spec, out_spec],
        ),
        compiler_params=pltpu.CompilerParams(
            dimension_semantics=("parallel", "arbitrary")),
    )(*inputs)

    # TODO(synk): the cross-lane reduce of these (splits, 8, 128) partials
    # could move in-kernel on the last j step (idle XLU) to shrink this tiny
    # epilogue fusion further; only matters for very small inputs.
    n = jnp.sum(cnts)
    mean_d = jnp.sum(sums) / n
    mean_d2 = jnp.sum(sumsqs) / n
    # Clamp tiny negative f32 roundoff so sqrt() never spuriously returns NaN.
    arg = jnp.maximum(mean_d2 - variance_focus * mean_d * mean_d, 0.0)
    return jnp.sqrt(arg) * 10.0


def _reference(depth_est, depth_gt, mask, variance_focus):
    m = jnp.asarray(mask).reshape(-1) != 0
    est = depth_est.reshape(-1).astype(jnp.float32)
    gt = depth_gt.reshape(-1).astype(jnp.float32)
    d = jnp.where(m,
                  jnp.log(jnp.where(m, est, 1.0)) - jnp.log(jnp.where(m, gt, 1.0)),
                  0.0)
    n = jnp.sum(m.astype(jnp.float32))
    mean_d = jnp.sum(d) / n
    mean_d2 = jnp.sum(d * d) / n
    return jnp.sqrt(mean_d2 - variance_focus * mean_d ** 2) * 10.0


if __name__ == "__main__":
    key = jax.random.PRNGKey(0)
    k1, k2, k3, k4, k5, k6 = jax.random.split(key, 6)
    variance_focus = 0.85

    # 1) NCHW depth tensors with an explicit boolean mask (PyTorch-style).
    B, C, H, W = 2, 4, 16, 16
    depth_est = jax.random.uniform(k1, (B, C, H, W), jnp.float32,
                                   minval=0.1, maxval=10.0)
    depth_gt = jax.random.uniform(k2, (B, C, H, W), jnp.float32,
                                  minval=0.1, maxval=10.0)
    mask = jax.random.uniform(k3, (B, C, H, W), jnp.float32) > 0.3

    out = jax.block_until_ready(
        silog_loss(depth_est, depth_gt, mask, variance_focus=variance_focus))
    ref = _reference(depth_est, depth_gt, mask, variance_focus)
    assert jnp.allclose(out, ref, rtol=1e-4, atol=1e-4), (out, ref)

    # 2) Mask-free fast path: validity derived in-kernel from gt > min_depth.
    out_fast = jax.block_until_ready(
        silog_loss(depth_est, depth_gt,
                   variance_focus=variance_focus, min_depth=1.0))
    ref_fast = _reference(depth_est, depth_gt, depth_gt > 1.0, variance_focus)
    assert jnp.allclose(out_fast, ref_fast, rtol=1e-4, atol=1e-4), (out_fast,
                                                                    ref_fast)

    # 3) Row count (40) not a multiple of the 32-row tile: exercises the
    #    2-way split, the ragged-last-block cold path, and a float mask
    #    streamed in its native dtype.
    shp = (1, 1, 40, 128)
    est_r = jax.random.uniform(k4, shp, jnp.float32, minval=0.1, maxval=10.0)
    gt_r = jax.random.uniform(k5, shp, jnp.float32, minval=0.1, maxval=10.0)
    mask_r = (jax.random.uniform(k6, shp, jnp.float32) > 0.3).astype(jnp.float32)

    out_r = jax.block_until_ready(
        silog_loss(est_r, gt_r, mask_r, variance_focus=variance_focus))
    ref_r = _reference(est_r, gt_r, mask_r, variance_focus)
    assert jnp.allclose(out_r, ref_r, rtol=1e-4, atol=1e-4), (out_r, ref_r)

    print("KERNEL_OK")
</pallas_src>

<mosaic_0001>
module attributes {stable_mosaic.version = 11 : i64} {
  func.func @_silog_partial_kernel(%arg0: i32, %arg1: i32, %arg2: memref<32x128xf32, #tpu.memory_space<vmem>>, %arg3: memref<32x128xf32, #tpu.memory_space<vmem>>, %arg4: memref<32x128xi8, #tpu.memory_space<vmem>>, %arg5: memref<1x8x128xf32, #tpu.memory_space<vmem>>, %arg6: memref<1x8x128xf32, #tpu.memory_space<vmem>>, %arg7: memref<1x8x128xf32, #tpu.memory_space<vmem>>) attributes {dimension_semantics = [#tpu.dimension_semantics<parallel>, #tpu.dimension_semantics<arbitrary>], iteration_bounds = array<i64: 1, 1>, scalar_prefetch = 0 : i64, scratch_operands = 0 : i64, tpu.core_type = #tpu.core_type<tc>, window_params = [{transform_indices = @transform_0, window_bounds = array<i64: 32, 128>}, {transform_indices = @transform_1, window_bounds = array<i64: 32, 128>}, {transform_indices = @transform_2, window_bounds = array<i64: 32, 128>}, {transform_indices = @transform_3, window_bounds = array<i64: 1, 8, 128>}, {transform_indices = @transform_4, window_bounds = array<i64: 1, 8, 128>}, {transform_indices = @transform_5, window_bounds = array<i64: 1, 8, 128>}]} {
    %c0_i32 = arith.constant 0 : i32
    %0 = arith.cmpi eq, %arg1, %c0_i32 : i32
    %1 = arith.extui %0 : i1 to i32
    %c0_i32_0 = arith.constant 0 : i32
    %2 = arith.cmpi ne, %1, %c0_i32_0 : i32
    scf.if %2 {
      %cst_23 = arith.constant 0.000000e+00 : f32
      %63 = vector.broadcast %cst_23 : f32 to vector<8x128xf32>
      %c0_24 = arith.constant 0 : index
      %c0_25 = arith.constant 0 : index
      %c0_26 = arith.constant 0 : index
      %64 = vector.load %arg5[%c0_24, %c0_25, %c0_26] : memref<1x8x128xf32, #tpu.memory_space<vmem>>, vector<1x8x128xf32>
      %65 = vector.shape_cast %64 : vector<1x8x128xf32> to vector<8x128xf32>
      %66 = vector.shape_cast %63 : vector<8x128xf32> to vector<1x8x128xf32>
      tpu.vector_store %arg5[%c0_24, %c0_25, %c0_26], %66 {strides = array<i32>} : memref<1x8x128xf32, #tpu.memory_space<vmem>>, vector<1x8x128xf32>,
      %cst_27 = arith.constant 0.000000e+00 : f32
      %67 = vector.broadcast %cst_27 : f32 to vector<8x128xf32>
      %c0_28 = arith.constant 0 : index
      %c0_29 = arith.constant 0 : index
      %c0_30 = arith.constant 0 : index
      %68 = vector.load %arg6[%c0_28, %c0_29, %c0_30] : memref<1x8x128xf32, #tpu.memory_space<vmem>>, vector<1x8x128xf32>
      %69 = vector.shape_cast %68 : vector<1x8x128xf32> to vector<8x128xf32>
      %70 = vector.shape_cast %67 : vector<8x128xf32> to vector<1x8x128xf32>
      tpu.vector_store %arg6[%c0_28, %c0_29, %c0_30], %70 {strides = array<i32>} : memref<1x8x128xf32, #tpu.memory_space<vmem>>, vector<1x8x128xf32>,
      %cst_31 = arith.constant 0.000000e+00 : f32
      %71 = vector.broadcast %cst_31 : f32 to vector<8x128xf32>
      %c0_32 = arith.constant 0 : index
      %c0_33 = arith.constant 0 : index
      %c0_34 = arith.constant 0 : index
      %72 = vector.load %arg7[%c0_32, %c0_33, %c0_34] : memref<1x8x128xf32, #tpu.memory_space<vmem>>, vector<1x8x128xf32>
      %73 = vector.shape_cast %72 : vector<1x8x128xf32> to vector<8x128xf32>
      %74 = vector.shape_cast %71 : vector<8x128xf32> to vector<1x8x128xf32>
      tpu.vector_store %arg7[%c0_32, %c0_33, %c0_34], %74 {strides = array<i32>} : memref<1x8x128xf32, #tpu.memory_space<vmem>>, vector<1x8x128xf32>,
    } else {
    }
    %cst = arith.constant 0.000000e+00 : f32
    %3 = vector.broadcast %cst : f32 to vector<8x128xf32>
    %c0_i32_1 = arith.constant 0 : i32
    %c32_i32 = arith.constant 32 : i32
    %4 = arith.muli %c0_i32_1, %c32_i32 : i32
    %5 = tpu.assume_multiple %4, 32 : i32
    %6 = arith.index_cast %5 : i32 to index
    %c0 = arith.constant 0 : index
    %7 = vector.load %arg2[%6, %c0] : memref<32x128xf32, #tpu.memory_space<vmem>>, vector<32x128xf32>
    %8 = arith.index_cast %5 : i32 to index
    %c0_2 = arith.constant 0 : index
    %9 = vector.load %arg3[%8, %c0_2] : memref<32x128xf32, #tpu.memory_space<vmem>>, vector<32x128xf32>
    %10 = arith.index_cast %5 : i32 to index
    %c0_3 = arith.constant 0 : index
    %11 = vector.load %arg4[%10, %c0_3] : memref<32x128xi8, #tpu.memory_space<vmem>>, vector<32x128xi8>
    %c0_i8 = arith.constant 0 : i8
    %12 = vector.broadcast %c0_i8 : i8 to vector<32x128xi8>
    %13 = arith.cmpi ne, %11, %12 : vector<32x128xi8>
    %14 = arith.divf %7, %9 : vector<32x128xf32>
    %15 = math.log %14 : vector<32x128xf32>
    %cst_4 = arith.constant 0.000000e+00 : f32
    %16 = vector.broadcast %cst_4 : f32 to vector<32x128xf32>
    %17 = arith.select %13, %15, %16 : vector<32x128xi1>, vector<32x128xf32>
    %18 = vector.extract_strided_slice %17 {offsets = [0, 0], sizes = [8, 128], strides = [1, 1]} : vector<32x128xf32> to vector<8x128xf32>
    %19 = vector.extract_strided_slice %17 {offsets = [8, 0], sizes = [8, 128], strides = [1, 1]} : vector<32x128xf32> to vector<8x128xf32>
    %20 = arith.addf %18, %19 : vector<8x128xf32>
    %21 = vector.extract_strided_slice %17 {offsets = [16, 0], sizes = [8, 128], strides = [1, 1]} : vector<32x128xf32> to vector<8x128xf32>
    %22 = arith.addf %20, %21 : vector<8x128xf32>
    %23 = vector.extract_strided_slice %17 {offsets = [24, 0], sizes = [8, 128], strides = [1, 1]} : vector<32x128xf32> to vector<8x128xf32>
    %24 = arith.addf %22, %23 : vector<8x128xf32>
    %25 = arith.addf %3, %24 : vector<8x128xf32>
    %26 = arith.mulf %17, %17 : vector<32x128xf32>
    %27 = vector.extract_strided_slice %26 {offsets = [0, 0], sizes = [8, 128], strides = [1, 1]} : vector<32x128xf32> to vector<8x128xf32>
    %28 = vector.extract_strided_slice %26 {offsets = [8, 0], sizes = [8, 128], strides = [1, 1]} : vector<32x128xf32> to vector<8x128xf32>
    %29 = arith.addf %27, %28 : vector<8x128xf32>
    %30 = vector.extract_strided_slice %26 {offsets = [16, 0], sizes = [8, 128], strides = [1, 1]} : vector<32x128xf32> to vector<8x128xf32>
    %31 = arith.addf %29, %30 : vector<8x128xf32>
    %32 = vector.extract_strided_slice %26 {offsets = [24, 0], sizes = [8, 128], strides = [1, 1]} : vector<32x128xf32> to vector<8x128xf32>
    %33 = arith.addf %31, %32 : vector<8x128xf32>
    %34 = arith.addf %3, %33 : vector<8x128xf32>
    %35 = arith.extui %13 : vector<32x128xi1> to vector<32x128xi32>
    %36 = arith.sitofp %35 : vector<32x128xi32> to vector<32x128xf32>
    %37 = vector.extract_strided_slice %36 {offsets = [0, 0], sizes = [8, 128], strides = [1, 1]} : vector<32x128xf32> to vector<8x128xf32>
    %38 = vector.extract_strided_slice %36 {offsets = [8, 0], sizes = [8, 128], strides = [1, 1]} : vector<32x128xf32> to vector<8x128xf32>
    %39 = arith.addf %37, %38 : vector<8x128xf32>
    %40 = vector.extract_strided_slice %36 {offsets = [16, 0], sizes = [8, 128], strides = [1, 1]} : vector<32x128xf32> to vector<8x128xf32>
    %41 = arith.addf %39, %40 : vector<8x128xf32>
    %42 = vector.extract_strided_slice %36 {offsets = [24, 0], sizes = [8, 128], strides = [1, 1]} : vector<32x128xf32> to vector<8x128xf32>
    %43 = arith.addf %41, %42 : vector<8x128xf32>
    %44 = arith.addf %3, %43 : vector<8x128xf32>
    %c1_i32 = arith.constant 1 : i32
    %c0_5 = arith.constant 0 : index
    %c0_6 = arith.constant 0 : index
    %c0_7 = arith.constant 0 : index
    %45 = vector.load %arg5[%c0_5, %c0_6, %c0_7] : memref<1x8x128xf32, #tpu.memory_space<vmem>>, vector<1x8x128xf32>
    %46 = vector.shape_cast %45 : vector<1x8x128xf32> to vector<8x128xf32>
    %47 = arith.addf %46, %25 : vector<8x128xf32>
    %c0_8 = arith.constant 0 : index
    %c0_9 = arith.constant 0 : index
    %c0_10 = arith.constant 0 : index
    %48 = vector.load %arg5[%c0_8, %c0_9, %c0_10] : memref<1x8x128xf32, #tpu.memory_space<vmem>>, vector<1x8x128xf32>
    %49 = vector.shape_cast %48 : vector<1x8x128xf32> to vector<8x128xf32>
    %50 = vector.shape_cast %47 : vector<8x128xf32> to vector<1x8x128xf32>
    tpu.vector_store %arg5[%c0_8, %c0_9, %c0_10], %50 {strides = array<i32>} : memref<1x8x128xf32, #tpu.memory_space<vmem>>, vector<1x8x128xf32>,
    %c0_11 = arith.constant 0 : index
    %c0_12 = arith.constant 0 : index
    %c0_13 = arith.constant 0 : index
    %51 = vector.load %arg6[%c0_11, %c0_12, %c0_13] : memref<1x8x128xf32, #tpu.memory_space<vmem>>, vector<1x8x128xf32>
    %52 = vector.shape_cast %51 : vector<1x8x128xf32> to vector<8x128xf32>
    %53 = arith.addf %52, %34 : vector<8x128xf32>
    %c0_14 = arith.constant 0 : index
    %c0_15 = arith.constant 0 : index
    %c0_16 = arith.constant 0 : index
    %54 = vector.load %arg6[%c0_14, %c0_15, %c0_16] : memref<1x8x128xf32, #tpu.memory_space<vmem>>, vector<1x8x128xf32>
    %55 = vector.shape_cast %54 : vector<1x8x128xf32> to vector<8x128xf32>
    %56 = vector.shape_cast %53 : vector<8x128xf32> to vector<1x8x128xf32>
    tpu.vector_store %arg6[%c0_14, %c0_15, %c0_16], %56 {strides = array<i32>} : memref<1x8x128xf32, #tpu.memory_space<vmem>>, vector<1x8x128xf32>,
    %c0_17 = arith.constant 0 : index
    %c0_18 = arith.constant 0 : index
    %c0_19 = arith.constant 0 : index
    %57 = vector.load %arg7[%c0_17, %c0_18, %c0_19] : memref<1x8x128xf32, #tpu.memory_space<vmem>>, vector<1x8x128xf32>
    %58 = vector.shape_cast %57 : vector<1x8x128xf32> to vector<8x128xf32>
    %59 = arith.addf %58, %44 : vector<8x128xf32>
    %c0_20 = arith.constant 0 : index
    %c0_21 = arith.constant 0 : index
    %c0_22 = arith.constant 0 : index
    %60 = vector.load %arg7[%c0_20, %c0_21, %c0_22] : memref<1x8x128xf32, #tpu.memory_space<vmem>>, vector<1x8x128xf32>
    %61 = vector.shape_cast %60 : vector<1x8x128xf32> to vector<8x128xf32>
    %62 = vector.shape_cast %59 : vector<8x128xf32> to vector<1x8x128xf32>
    tpu.vector_store %arg7[%c0_20, %c0_21, %c0_22], %62 {strides = array<i32>} : memref<1x8x128xf32, #tpu.memory_space<vmem>>, vector<1x8x128xf32>,
    return
  }
  func.func @transform_0(%arg0: i32, %arg1: i32) -> (i32, i32) {
    %c1_i32 = arith.constant 1 : i32
    %0 = arith.muli %arg0, %c1_i32 : i32
    %1 = arith.addi %0, %arg1 : i32
    %c0_i32 = arith.constant 0 : i32
    %c0_i32_0 = arith.constant 0 : i32
    return %1, %c0_i32 : i32, i32
  }
  func.func @transform_1(%arg0: i32, %arg1: i32) -> (i32, i32) {
    %c1_i32 = arith.constant 1 : i32
    %0 = arith.muli %arg0, %c1_i32 : i32
    %1 = arith.addi %0, %arg1 : i32
    %c0_i32 = arith.constant 0 : i32
    %c0_i32_0 = arith.constant 0 : i32
    return %1, %c0_i32 : i32, i32
  }
  func.func @transform_2(%arg0: i32, %arg1: i32) -> (i32, i32) {
    %c1_i32 = arith.constant 1 : i32
    %0 = arith.muli %arg0, %c1_i32 : i32
    %1 = arith.addi %0, %arg1 : i32
    %c0_i32 = arith.constant 0 : i32
    %c0_i32_0 = arith.constant 0 : i32
    return %1, %c0_i32 : i32, i32
  }
  func.func @transform_3(%arg0: i32, %arg1: i32) -> (i32, i32, i32) {
    %c0_i32 = arith.constant 0 : i32
    %c0_i32_0 = arith.constant 0 : i32
    %c0_i32_1 = arith.constant 0 : i32
    return %arg0, %c0_i32, %c0_i32_0 : i32, i32, i32
  }
  func.func @transform_4(%arg0: i32, %arg1: i32) -> (i32, i32, i32) {
    %c0_i32 = arith.constant 0 : i32
    %c0_i32_0 = arith.constant 0 : i32
    %c0_i32_1 = arith.constant 0 : i32
    return %arg0, %c0_i32, %c0_i32_0 : i32, i32, i32
  }
  func.func @transform_5(%arg0: i32, %arg1: i32) -> (i32, i32, i32) {
    %c0_i32 = arith.constant 0 : i32
    %c0_i32_0 = arith.constant 0 : i32
    %c0_i32_1 = arith.constant 0 : i32
    return %arg0, %c0_i32, %c0_i32_0 : i32, i32, i32
  }
}

</mosaic_0001>

<bundles_post_ra>
// kernel: silog_loss.1
= control target key start
LH: loop header
LB: loop body
LE: loop exit
PB: predicated region body
PF: predicated region fallthrough
CT: control target
= control target key end

     0   :  { %v283_v16 = vmov 0   ;;  %s476_s1 = inlined_call_operand.vmem [shape: f32[32,128], index: 1, kind: input, shape index: {}]   ;;  %s477_s2 = inlined_call_operand.vmem [shape: s8[32,128], index: 2, kind: input, shape index: {}]   ;;  %s478_s0 = inlined_call_operand.vmem [shape: f32[32,128], index: 0, kind: input, shape index: {}]   ;;  %s479_s5 = inlined_call_operand.vmem [shape: f32[1,8,128], index: 5, kind: output, shape index: {2}]   ;;  %s480_s3 = inlined_call_operand.vmem [shape: f32[1,8,128], index: 3, kind: output, shape index: {0}]   ;;  %s481_s4 = inlined_call_operand.vmem [shape: f32[1,8,128], index: 4, kind: output, shape index: {1}]  }
   0x1   :  { %v91_v0 = vld [vmem:[%s476_s1] sm:$0xff]  ;;  %v321_v1 = vld [vmem:[%s476_s1 + $0x8] sm:$0xff]  ;;  %v326_v2 = vld [vmem:[%s476_s1 + $0x10] sm:$0xff] }
   0x2   :  { %v95_v3 = vld [vmem:[%s477_s2] sm:$0xff]  ;;  %267 = vrcp.f32 %v91_v0  ;;  %v108_v4 = vand.u32 2147483648, %v91_v0  ;;  %v334_v5 = vld [vmem:[%s476_s1 + $0x18] sm:$0xff]  ;;  %v106_v6 = vand.u32 2147483647, %v91_v0  ;;  %v123_v8 = vand.u32 2147483648, %v321_v1 }
   0x3   :  { %269 = vrcp.f32 %v321_v1  ;;  %vm96_vm0 = vnez %v95_v3  ;;  %v121_v7 = vand.u32 2147483647, %v321_v1  ;;  %vm102_vm1 = vweird.f32 %v91_v0  ;;  %v87_v53 = vld [vmem:[%s478_s0] sm:$0xff]  ;;  %v88_v57 = vld [vmem:[%s478_s0 + $0x8] sm:$0xff]  ;;  %v89_v62 = vld [vmem:[%s478_s0 + $0x10] sm:$0xff] }
   0x4   :  { %271 = vrcp.f32 %v326_v2  ;;  %vm117_vm2 = vweird.f32 %v321_v1  ;;  %v136_v9 = vand.u32 2147483647, %v326_v2  ;;  %v138_v10 = vand.u32 2147483648, %v326_v2 }
   0x5   :  { %v343_v11 = vor.u32 1.1754944e-38, %v108_v4  ;;  %v345_v12 = vor.u32 1.1754944e-38, %v123_v8  ;;  %vm132_vm3 = vweird.f32 %v326_v2  ;;  %273 = vrcp.f32 %v334_v5 }
   0x6   :  { %vm349_vm4 = vcmp.eq.f32.partialorder %v106_v6, 8.507059e+37  ;;  %vm147_vm5 = vweird.f32 %v334_v5  ;;  %v151_v14 = vand.u32 2147483647, %v334_v5  ;;  %v153_v15 = vand.u32 2147483648, %v334_v5 }
   0x7   :  { %v165_v17 = vsel %vm96_vm0, 16843009, %v283_v16  ;;  %vm357_vm6 = vcmp.eq.f32.partialorder %v121_v7, 8.507059e+37  ;;  %v361_v20 = vor.u32 1.1754944e-38, %v138_v10  ;;  %vm363_vm8 = vcmp.eq.f32.partialorder %v136_v9, 8.507059e+37  ;;  %v90_v9 = vld [vmem:[%s478_s0 + $0x18] sm:$0xff] }
   0x8   :  { %v268_v18 = vpop.eup %267  ;;  %v166_v21 = vunpack.c.0.s8 %v165_v17  ;;  %v167_v22 = vunpack.c.1.s8 %v165_v17  ;;  %v168_v23 = vunpack.c.2.s8 %v165_v17  ;;  %v367_v27 = vor.u32 1.1754944e-38, %v153_v15 }
   0x9   :  { %v270_v24 = vpop.eup %269  ;;  %v98_v25 = vmul.f32 %v268_v18, %v91_v0  ;;  %vm103_vm7 = vweird.f32 %v268_v18  ;;  %v169_v28 = vunpack.c.3.s8 %v165_v17  ;;  %vm371_vm11 = vcmp.eq.f32.partialorder %v151_v14, 8.507059e+37 }
   0xa   :  { %v272_v29 = vpop.eup %271  ;;  %v113_v30 = vmul.f32 %v270_v24, %v321_v1  ;;  %vm118_vm9 = vweird.f32 %v270_v24  ;;  %v170_v31 = vpack.c.b16 %v166_v21, %v166_v21  ;;  %v172_v32 = vpack.c.b16 %v167_v22, %v167_v22  ;;  %vm378_vm13 = vmor %vm102_vm1, %vm103_vm7 }
   0xb   :  { %v99_v33 = vsub.f32 1.0, %v98_v25  ;;  %v128_v34 = vmul.f32 %v272_v29, %v326_v2  ;;  %vm133_vm10 = vweird.f32 %v272_v29  ;;  %v174_v36 = vpack.c.b16 %v168_v23, %v168_v23  ;;  %v274_v37 = vpop.eup %273  ;;  %vm385_vm15 = vmor %vm117_vm2, %vm118_vm9 }
   0xc   :  { %v114_v38 = vsub.f32 1.0, %v113_v30  ;;  %v171_v39 = vpack.c.b8 %v170_v31, %v170_v31  ;;  %v173_v40 = vpack.c.b8 %v172_v32, %v172_v32  ;;  %v176_v41 = vpack.c.b16 %v169_v28, %v169_v28  ;;  %vm395_vm1 = vmor %vm132_vm3, %vm133_vm10 }
   0xd   :  { %v100_v42 = vmul.f32 %v268_v18, %v99_v33  ;;  %v129_v43 = vsub.f32 1.0, %v128_v34  ;;  %v143_v44 = vmul.f32 %v274_v37, %v334_v5  ;;  %vm148_vm12 = vweird.f32 %v274_v37 }
   0xe   :  { %v115_v46 = vmul.f32 %v270_v24, %v114_v38  ;;  %v175_v47 = vpack.c.b8 %v174_v36, %v174_v36  ;;  %v177_v48 = vpack.c.b8 %v176_v41, %v176_v41  ;;  %vm178_vm14 = vnez %v171_v39  ;;  %vm415_vm3 = vmor %vm147_vm5, %vm148_vm12 }
   0xf   :  { %v101_v49 = vadd.f32 %v268_v18, %v100_v42  ;;  %v130_v51 = vmul.f32 %v272_v29, %v129_v43  ;;  %v144_v52 = vsub.f32 1.0, %v143_v44  ;;  %vm179_vm0 = vnez %v173_v40 }
  0x10   :  { %v116_v54 = vadd.f32 %v270_v24, %v115_v46  ;;  %vm180_vm7 = vnez %v175_v47  ;;  %vm181_vm2 = vnez %v177_v48  ;;  %v182_v56 = vsel %vm178_vm14, 16843009, %v283_v16 }
  0x11   :  { %v105_v58 = vsel %vm378_vm13, %v268_v18, %v101_v49  ;;  %v131_v59 = vadd.f32 %v272_v29, %v130_v51  ;;  %v145_v60 = vmul.f32 %v274_v37, %v144_v52  ;;  %v183_v61 = vsel %vm179_vm0, 16843009, %v283_v16 }
  0x12   :  { %v110_v63 = vsel %vm349_vm4, %v343_v11, %v105_v58  ;;  %v120_v0 = vsel %vm385_vm15, %v270_v24, %v116_v54  ;;  %v184_v2 = vsel %vm180_vm7, 16843009, %v283_v16  ;;  %v185_v3 = vsel %vm181_vm2, 16843009, %v283_v16 }
  0x13   :  { %v111_v4 = vmul.f32 %v110_v63, %v87_v53  ;;  %v125_v6 = vsel %vm357_vm6, %v345_v12, %v120_v0  ;;  %v135_v7 = vsel %vm395_vm1, %v272_v29, %v131_v59  ;;  %v146_v8 = vadd.f32 %v274_v37, %v145_v60 }
  0x14   :  { %v126_v5 = vmul.f32 %v125_v6, %v88_v57  ;;  %v140_v10 = vsel %vm363_vm8, %v361_v20, %v135_v7  ;;  %v186_v11 = vunpack.c.0.s8 %v182_v56  ;;  %v187_v13 = vunpack.c.0.s8 %v183_v61 }
  0x15   :  { %v141_v14 = vmul.f32 %v140_v10, %v89_v62  ;;  %v150_v15 = vsel %vm415_vm3, %v274_v37, %v146_v8  ;;  %275 = vlog2.f32 %v111_v4  ;;  %v188_v12 = vunpack.c.0.s8 %v184_v2 }
  0x16   :  { %v155_v16 = vsel %vm371_vm11, %v367_v27, %v150_v15  ;;  %277 = vlog2.f32 %v126_v5  ;;  %v189_v17 = vunpack.c.0.s8 %v185_v3  ;;  %vm435_vm4 = vcmp.ne.s32.totalorder %v186_v11, 0 }
  0x17   :  { %v156_v19 = vmul.f32 %v155_v16, %v90_v9  ;;  %279 = vlog2.f32 %v141_v14  ;;  %vm439_vm5 = vcmp.ne.s32.totalorder %v187_v13, 0  ;;  %vm443_vm6 = vcmp.ne.s32.totalorder %v188_v12, 0 }
  0x18   :  { %v284_v22 = vmov 0.0   ;;  %vm453_vm8 = vcmp.ne.s32.totalorder %v189_v17, 0 }
  0x19   :  { %v261_v23 = vsel %vm435_vm4, 1.0, %v284_v22  ;;  %v262_v24 = vsel %vm439_vm5, 1.0, %v284_v22  ;;  %v263_v25 = vsel %vm443_vm6, 1.0, %v284_v22  ;;  %281 = vlog2.f32 %v156_v19 }
  0x1a   :  { %v218_v27 = vadd.f32 %v262_v24, %v261_v23  ;;  %v264_v28 = vsel %vm453_vm8, 1.0, %v284_v22 }
  0x1b   :  { %v276_v29 = vpop.eup %275 }
  0x1c   :  { %v219_v30 = vadd.f32 %v263_v25, %v218_v27  ;;  %v278_v31 = vpop.eup %277  ;;  %v158_v32 = vmul.f32 0.6931472, %v276_v29 }
  0x1d   :  { %v280_v33 = vpop.eup %279  ;;  %v160_v34 = vmul.f32 0.6931472, %v278_v31 }
  0x1e   :  { %v220_v35 = vadd.f32 %v264_v28, %v219_v30  ;;  %v162_v36 = vmul.f32 0.6931472, %v280_v33  ;;  %v194_v37 = vsel %vm435_vm4, %v158_v32, 0.0 }
  0x1f   :  { %v282_v38 = vpop.eup %281  ;;  %v195_v39 = vsel %vm439_vm5, %v160_v34, 0.0  ;;  %v202_v40 = vmul.f32 %v194_v37, %v194_v37 }
  0x20   :  { %v164_v41 = vmul.f32 0.6931472, %v282_v38  ;;  %v196_v42 = vsel %vm443_vm6, %v162_v36, 0.0  ;;  %v198_v43 = vadd.f32 %v195_v39, %v194_v37  ;;  %v203_v44 = vmul.f32 %v195_v39, %v195_v39  ;;  %230 = vst [vmem:[%s479_s5] sm:$0xff] %v220_v35 }
  0x21   :  { %v204_v45 = vmul.f32 %v196_v42, %v196_v42 }
  0x22   :  { %v197_v46 = vsel %vm453_vm8, %v164_v41, 0.0  ;;  %v199_v47 = vadd.f32 %v198_v43, %v196_v42  ;;  %v206_v48 = vadd.f32 %v203_v44, %v202_v40 }
  0x23   :  { %v205_v49 = vmul.f32 %v197_v46, %v197_v46 }
  0x24   :  { %v200_v50 = vadd.f32 %v199_v47, %v197_v46  ;;  %v207_v51 = vadd.f32 %v206_v48, %v204_v45 }
  0x26   :  { %v208_v52 = vadd.f32 %v207_v51, %v205_v49  ;;  %224 = vst [vmem:[%s480_s3] sm:$0xff] %v200_v50 }
  0x28   :  { %227 = vst [vmem:[%s481_s4] sm:$0xff] %v208_v52 }

</bundles_post_ra>
